<compile_context>
chip_gen: v5e
topology: v5e:2x2
jax: 0.10.0
libtpu: 0.0.40
codegen_flags: <defaults>
</compile_context>

<pallas_src>
import math
import functools

import jax
import jax.numpy as jnp
from jax import lax
from jax.experimental import pallas as pl
from jax.experimental.pallas import tpu as pltpu


# ----------------------------------------------------------------------------- kernel
def _mlp_kernel(x_ref, w_ref, b_ref, o_ref, acc_ref, *, mxu_dtype):
    # x_ref: (tm, tk), w_ref: (tk, tn), b_ref: (1, tn), o_ref: (tm, tn)
    # acc_ref: (tm, tn) f32 scratch, resident across the K grid axis (axis 2).
    k = pl.program_id(2)

    @pl.when(k == 0)
    def _():
        acc_ref[...] = jnp.zeros_like(acc_ref)

    x_t = x_ref[...]
    w_t = w_ref[...]
    if mxu_dtype is not None and x_t.dtype != mxu_dtype:
        # Feed the MXU bf16 (peak throughput path on v5e/v6e/v7x); keep the
        # f32 accumulator and f32 epilogue to bound the numerical error.
        x_t = x_t.astype(mxu_dtype)
        w_t = w_t.astype(mxu_dtype)

    acc_ref[...] += jnp.dot(x_t, w_t, preferred_element_type=jnp.float32)

    @pl.when(k == pl.num_programs(2) - 1)
    def _():
        h = acc_ref[...] + b_ref[...].astype(jnp.float32)
        # exact (erf-based) GELU, matching torch.nn.GELU() default
        g = 0.5 * h * (1.0 + lax.erf(h * jnp.float32(1.0 / math.sqrt(2.0))))
        o_ref[...] = g.astype(o_ref.dtype)


# ----------------------------------------------------------------------------- helpers
def _round_up(x, m):
    return ((x + m - 1) // m) * m


def _cdiv(a, b):
    return -(-a // b)


def _sublane_align(dtype):
    # sublane packing: 8 rows (32-bit), 16 (bf16), 32 (int8 / fp8)
    return max(8, 32 // jnp.dtype(dtype).itemsize)


@functools.lru_cache(maxsize=None)
def _vmem_budget_bytes():
    """Generation-aware VMEM cap: ~75% of physical VMEM, at most 96 MiB."""
    cap = None
    try:
        cap = getattr(pltpu.get_tpu_info(), "vmem_capacity_bytes", None)
    except Exception:
        cap = None
    if not cap:
        cap = 64 << 20  # conservative (v7x-sized) fallback
    return int(min(cap * 3 // 4, 96 << 20))


# ----------------------------------------------------------------------------- wrapper
@functools.partial(
    jax.jit, static_argnames=("block_m", "block_n", "block_k", "use_bf16_mxu")
)
def mlp_forward(x, w, b, *, block_m=1024, block_n=1024, block_k=512,
                use_bf16_mxu=True):
    """y = GELU(x @ w + b).  x: (..., in_dim); w: (in_dim, out_dim); b: (out_dim,)."""
    *lead, K = x.shape
    N = w.shape[1]
    M = 1
    for d in lead:
        M *= d

    x2 = x.reshape(M, K)
    b2 = b.reshape(1, N)
    out_dtype = x.dtype

    vmem_budget = _vmem_budget_bytes()

    # --- tile sizes ------------------------------------------------------------
    align_m = _sublane_align(out_dtype)
    tm = min(block_m, _round_up(M, align_m))
    tn = min(block_n, _round_up(N, 128))

    # K tiling: a single full-K block when it fits (no K tail at all); otherwise a
    # 128-aligned tk, zero-padding the (rare) K tail so padded columns add 0.
    if K <= block_k:
        tk, Kp = K, K
    else:
        tk = _round_up(block_k, 128)
        Kp = _round_up(K, tk)

    itm = jnp.dtype(x.dtype).itemsize
    itw = jnp.dtype(w.dtype).itemsize
    ito = jnp.dtype(out_dtype).itemsize

    def working_set(tm_, tn_, tk_):
        # double-buffered x / w / out streams + f32 accumulator scratch
        return 2 * (tm_ * tk_ * itm + tk_ * tn_ * itw + tm_ * tn_ * ito) + tm_ * tn_ * 4

    # shrink-to-fit (rarely triggers at the defaults: ~20 MiB f32 working set)
    while working_set(tm, tn, tk) > vmem_budget:
        if tn >= tm and tn > 128:
            tn = max(128, _round_up(tn // 2, 128))
        elif tm > align_m:
            tm = max(align_m, _round_up(tm // 2, align_m))
        elif tk > 128 and tk != K:
            tk = max(128, _round_up(tk // 2, 128))
            Kp = _round_up(K, tk)
        else:
            break

    # Megacore (v7x has 2 TensorCores): keep the product of the "parallel" grid
    # axes >= 2 whenever the problem allows it, preferring an N split.
    gm, gn = _cdiv(M, tm), _cdiv(N, tn)
    if gm * gn < 2:
        if N > 128 and tn > 128:
            tn = _round_up(_cdiv(N, 2), 128)
        elif M > align_m and tm > align_m:
            tm = _round_up(_cdiv(M, 2), align_m)
    gm, gn, gk = _cdiv(M, tm), _cdiv(N, tn), Kp // tk

    # --- K-tail zero padding (only when K > block_k and K % tk != 0) ------------
    wp = w
    if Kp != K:
        # TODO(synk): for a real model, pre-pad the weight once at init instead of
        # per call; activations must stay zero-padded along K for correctness.
        x2 = jnp.pad(x2, ((0, 0), (0, Kp - K)))
        wp = jnp.pad(w, ((0, Kp - K), (0, 0)))

    cost = pl.CostEstimate(
        flops=2 * M * N * K,
        transcendentals=M * N,
        bytes_accessed=(M * K * itm + K * N * itw
                        + N * jnp.dtype(b.dtype).itemsize + M * N * ito),
    )

    mxu_dtype = jnp.bfloat16 if use_bf16_mxu else None
    kernel = functools.partial(_mlp_kernel, mxu_dtype=mxu_dtype)

    out2 = pl.pallas_call(
        kernel,
        out_shape=jax.ShapeDtypeStruct((M, N), out_dtype),
        grid_spec=pltpu.PrefetchScalarGridSpec(
            num_scalar_prefetch=0,
            grid=(gm, gn, gk),
            in_specs=[
                pl.BlockSpec((tm, tk), lambda i, j, k: (i, k)),   # x row/K tile
                pl.BlockSpec((tk, tn), lambda i, j, k: (k, j)),   # weight K/N tile
                pl.BlockSpec((1, tn), lambda i, j, k: (0, j)),    # bias N tile
            ],
            out_specs=pl.BlockSpec((tm, tn), lambda i, j, k: (i, j)),
            scratch_shapes=[pltpu.VMEM((tm, tn), jnp.float32)],
        ),
        compiler_params=pltpu.CompilerParams(
            dimension_semantics=("parallel", "parallel", "arbitrary"),
            vmem_limit_bytes=vmem_budget,
        ),
        cost_estimate=cost,
    )(x2, wp, b2)

    return out2.reshape(*lead, N)


# ----------------------------------------------------------------------------- init + reference
def init_mlp_params(key, in_dim, out_dim, dtype=jnp.float32):
    """Deterministic init mimicking torch.nn.Linear defaults."""
    kw, kb = jax.random.split(key)
    bound = 1.0 / math.sqrt(in_dim)
    w = jax.random.uniform(kw, (in_dim, out_dim), dtype, -bound, bound)  # (in, out)
    b = jax.random.uniform(kb, (out_dim,), dtype, -bound, bound)
    return w, b


def _ref_mlp(x, w, b, mxu_dtype=None):
    if mxu_dtype is not None:
        h = jnp.dot(x.astype(mxu_dtype), w.astype(mxu_dtype),
                    preferred_element_type=jnp.float32)
    else:
        h = jnp.dot(x, w, preferred_element_type=jnp.float32)
    h = h + b.astype(jnp.float32)
    g = 0.5 * h * (1.0 + lax.erf(h * jnp.float32(1.0 / math.sqrt(2.0))))
    return g.astype(x.dtype)


# ----------------------------------------------------------------------------- demo
if __name__ == "__main__":
    key = jax.random.PRNGKey(0)
    k_x, k_p, k_x2, k_p2, k_x3, k_p3 = jax.random.split(key, 6)

    # Case 1: small, tile-friendly shape — exact f32 MXU path, tight check.
    B, S, in_dim, out_dim = 2, 8, 16, 32
    x = jax.random.normal(k_x, (B, S, in_dim), jnp.float32)
    w, b = init_mlp_params(k_p, in_dim, out_dim)

    out_f32 = mlp_forward(x, w, b, use_bf16_mxu=False)
    jax.block_until_ready(out_f32)
    ref_f32 = _ref_mlp(x, w, b)
    assert out_f32.shape == (B, S, out_dim)
    assert jnp.allclose(out_f32, ref_f32, atol=1e-5, rtol=1e-5)

    # Case 2: same shape, default bf16 MXU feed — compare vs bf16-fed reference.
    out_bf16 = mlp_forward(x, w, b)
    jax.block_until_ready(out_bf16)
    ref_bf16 = _ref_mlp(x, w, b, mxu_dtype=jnp.bfloat16)
    assert jnp.allclose(out_bf16, ref_bf16, atol=2e-4, rtol=2e-4)
    assert jnp.allclose(out_bf16, ref_f32, atol=5e-2, rtol=5e-2)

    # Case 3: non-tile-aligned shape (partial M/N edge blocks, no HBM padding).
    B2, S2, in2, out2_dim = 3, 7, 20, 40
    xb = jax.random.normal(k_x2, (B2, S2, in2), jnp.float32)
    wb, bb = init_mlp_params(k_p2, in2, out2_dim)
    ob = mlp_forward(xb, wb, bb, use_bf16_mxu=False)
    jax.block_until_ready(ob)
    refb = _ref_mlp(xb, wb, bb)
    assert ob.shape == (B2, S2, out2_dim)
    assert jnp.allclose(ob, refb, atol=1e-5, rtol=1e-5)

    # Case 4: multi-step K reduction + megacore N split (block_k override).
    B3, S3, in3, out3 = 4, 64, 512, 256
    xc = jax.random.normal(k_x3, (B3, S3, in3), jnp.float32)
    wc, bc = init_mlp_params(k_p3, in3, out3)
    oc = mlp_forward(xc, wc, bc, block_k=256, use_bf16_mxu=False)
    jax.block_until_ready(oc)
    refc = _ref_mlp(xc, wc, bc)
    assert oc.shape == (B3, S3, out3)
    assert jnp.allclose(oc, refc, atol=1e-4, rtol=1e-4)

    print("KERNEL_OK")
</pallas_src>

<mosaic_0001>
module attributes {stable_mosaic.version = 11 : i64} {
  func.func @_mlp_kernel(%arg0: i32, %arg1: i32, %arg2: i32, %arg3: memref<8x16xf32, #tpu.memory_space<vmem>>, %arg4: memref<16x128xf32, #tpu.memory_space<vmem>>, %arg5: memref<1x128xf32, #tpu.memory_space<vmem>>, %arg6: memref<8x128xf32, #tpu.memory_space<vmem>>, %arg7: memref<8x128xf32, #tpu.memory_space<vmem>>) attributes {dimension_semantics = [#tpu.dimension_semantics<parallel>, #tpu.dimension_semantics<parallel>, #tpu.dimension_semantics<arbitrary>], iteration_bounds = array<i64: 2, 1, 1>, scalar_prefetch = 0 : i64, scratch_operands = 1 : i64, tpu.core_type = #tpu.core_type<tc>, window_params = [{transform_indices = @transform_0, window_bounds = array<i64: 8, 16>}, {transform_indices = @transform_1, window_bounds = array<i64: 16, 128>}, {transform_indices = @transform_2, window_bounds = array<i64: 1, 128>}, {transform_indices = @transform_3, window_bounds = array<i64: 8, 128>}]} {
    %c0_i32 = arith.constant 0 : i32
    %0 = arith.cmpi eq, %arg2, %c0_i32 : i32
    %1 = arith.extui %0 : i1 to i32
    %c0_i32_0 = arith.constant 0 : i32
    %2 = arith.cmpi ne, %1, %c0_i32_0 : i32
    scf.if %2 {
      %cst_10 = arith.constant 0.000000e+00 : f32
      %12 = vector.broadcast %cst_10 : f32 to vector<8x128xf32>
      %c0_11 = arith.constant 0 : index
      %c0_12 = arith.constant 0 : index
      %13 = vector.load %arg7[%c0_11, %c0_12] : memref<8x128xf32, #tpu.memory_space<vmem>>, vector<8x128xf32>
      tpu.vector_store %arg7[%c0_11, %c0_12], %12 {strides = array<i32>} : memref<8x128xf32, #tpu.memory_space<vmem>>, vector<8x128xf32>,
    } else {
    }
    %c0 = arith.constant 0 : index
    %c0_1 = arith.constant 0 : index
    %3 = vector.load %arg3[%c0, %c0_1] : memref<8x16xf32, #tpu.memory_space<vmem>>, vector<8x16xf32>
    %c0_2 = arith.constant 0 : index
    %c0_3 = arith.constant 0 : index
    %4 = vector.load %arg4[%c0_2, %c0_3] : memref<16x128xf32, #tpu.memory_space<vmem>>, vector<16x128xf32>
    %c0_4 = arith.constant 0 : index
    %c0_5 = arith.constant 0 : index
    %5 = vector.load %arg7[%c0_4, %c0_5] : memref<8x128xf32, #tpu.memory_space<vmem>>, vector<8x128xf32>
    %cst = arith.constant dense<0.000000e+00> : vector<8x128xf32>
    %6 = tpu.matmul %3, %4, %cst {dimension_numbers = #tpu.dot_dimension_numbers<[1], [0], [0], [1], [0, 0, 1, 1], [], []>} : vector<8x16xf32>, vector<16x128xf32>, vector<8x128xf32> -> vector<8x128xf32>
    %7 = arith.addf %5, %6 : vector<8x128xf32>
    %c0_6 = arith.constant 0 : index
    %c0_7 = arith.constant 0 : index
    %8 = vector.load %arg7[%c0_6, %c0_7] : memref<8x128xf32, #tpu.memory_space<vmem>>, vector<8x128xf32>
    tpu.vector_store %arg7[%c0_6, %c0_7], %7 {strides = array<i32>} : memref<8x128xf32, #tpu.memory_space<vmem>>, vector<8x128xf32>,
    %c0_i32_8 = arith.constant 0 : i32
    %9 = arith.cmpi eq, %arg2, %c0_i32_8 : i32
    %10 = arith.extui %9 : i1 to i32
    %c0_i32_9 = arith.constant 0 : i32
    %11 = arith.cmpi ne, %10, %c0_i32_9 : i32
    scf.if %11 {
      %c0_10 = arith.constant 0 : index
      %c0_11 = arith.constant 0 : index
      %12 = vector.load %arg7[%c0_10, %c0_11] : memref<8x128xf32, #tpu.memory_space<vmem>>, vector<8x128xf32>
      %c0_12 = arith.constant 0 : index
      %c0_13 = arith.constant 0 : index
      %13 = vector.load %arg5[%c0_12, %c0_13] : memref<1x128xf32, #tpu.memory_space<vmem>>, vector<1x128xf32>
      %14 = vector.broadcast %13 : vector<1x128xf32> to vector<8x128xf32>
      %15 = arith.addf %12, %14 : vector<8x128xf32>
      %cst_14 = arith.constant 5.000000e-01 : f32
      %16 = vector.broadcast %cst_14 : f32 to vector<8x128xf32>
      %17 = arith.mulf %16, %15 : vector<8x128xf32>
      %cst_15 = arith.constant 0.707106769 : f32
      %18 = vector.broadcast %cst_15 : f32 to vector<8x128xf32>
      %19 = arith.mulf %15, %18 : vector<8x128xf32>
      %20 = math.erf %19 : vector<8x128xf32>
      %cst_16 = arith.constant 1.000000e+00 : f32
      %21 = vector.broadcast %cst_16 : f32 to vector<8x128xf32>
      %22 = arith.addf %21, %20 : vector<8x128xf32>
      %23 = arith.mulf %17, %22 : vector<8x128xf32>
      %c0_17 = arith.constant 0 : index
      %c0_18 = arith.constant 0 : index
      %24 = vector.load %arg6[%c0_17, %c0_18] : memref<8x128xf32, #tpu.memory_space<vmem>>, vector<8x128xf32>
      tpu.vector_store %arg6[%c0_17, %c0_18], %23 {strides = array<i32>} : memref<8x128xf32, #tpu.memory_space<vmem>>, vector<8x128xf32>,
    } else {
    }
    return
  }
  func.func @transform_0(%arg0: i32, %arg1: i32, %arg2: i32) -> (i32, i32) {
    %c0_i32 = arith.constant 0 : i32
    return %arg0, %arg2 : i32, i32
  }
  func.func @transform_1(%arg0: i32, %arg1: i32, %arg2: i32) -> (i32, i32) {
    %c0_i32 = arith.constant 0 : i32
    return %arg2, %arg1 : i32, i32
  }
  func.func @transform_2(%arg0: i32, %arg1: i32, %arg2: i32) -> (i32, i32) {
    %c0_i32 = arith.constant 0 : i32
    %c0_i32_0 = arith.constant 0 : i32
    return %c0_i32, %arg1 : i32, i32
  }
  func.func @transform_3(%arg0: i32, %arg1: i32, %arg2: i32) -> (i32, i32) {
    %c0_i32 = arith.constant 0 : i32
    return %arg0, %arg1 : i32, i32
  }
}

</mosaic_0001>

<bundles_post_ra>
// kernel: mlp_forward.1
= control target key start
LH: loop header
LB: loop body
LE: loop exit
PB: predicated region body
PF: predicated region fallthrough
CT: control target
= control target key end

     0   :  { %8 = vsyncpa [#allocation4], 0  ;;  %s887_s0 = inlined_call_operand.hbm [shape: f32[16,16], index: 0, kind: input, shape index: {}]   ;;  %s888_s1 = inlined_call_operand.hbm [shape: f32[16,32], index: 1, kind: input, shape index: {}]   ;;  %s889_s2 = inlined_call_operand.vmem [shape: f32[1,32], index: 2, kind: input, shape index: {}]   ;;  %s890_s3 = inlined_call_operand.hbm [shape: f32[16,32], index: 3, kind: output, shape index: {}]  }
   0x1   :  { %10 = vsyncpa [#allocation4 + $0x1], 0 }
   0x2   :  { %11 = vsyncpa [#allocation7], 0 }
   0x3   :  { %12 = vsyncpa [#allocation5], 0 }
   0x4   :  { %14 = vsyncpa [#allocation5 + $0x1], 0  ;;  %s737_s12 = smov 0   ;;  %s739_s13 = smov 0  }
   0x5   :  { %s741_s14 = smov 0   ;;  %s743_s15 = smov 0  }
   0x6   :  { %s745_s16 = smov 0   ;;  %s747_s17 = smov 0  }
   0x7 LB: > { %s470_s18 = sadd.s32 4294967295, %s712_s17   ;;  %p472_p0 = scmp.ge.s32.totalorder %s712_s17, 1  ;;  %s712_s17 = sphi %s747_s17, %s20_s17   ;;  %s708_s16 = sphi %s745_s16, %s901_s16   ;;  %s704_s15 = sphi %s743_s15, %s900_s15   ;;  %s700_s14 = sphi %s741_s14, %s899_s14   ;;  %s696_s13 = sphi %s739_s13, %s898_s13   ;;  %s692_s12 = sphi %s737_s12, %s897_s12  }
   0x8   : > { %p769_p1 = scmp.eq.s32.totalorder %s470_s18, 0  ;;  %p154_p2 = scmp.lt.s32.totalorder %s712_s17, 3 }
   0x9   : > { %s169_s22 = sshll.u32 %s888_s1, 4  ;;  %s714_s24 = smov [#allocation6]   ;;  %s170_s22 = int_to_ptr.hbm [resolvable:$true] %s169_s22 }
   0xa   : > { %p777_p3 = pnand %p472_p0, %p154_p2  ;;  %s171_s25 = sshll.u32 %s714_s24, 4  ;;  %s172_s25 = int_to_ptr.vmem [resolvable:$true] %s171_s25 }
   0xb   : > { %p475_p6 = scmp.ge.s32.totalorder %s712_s17, 2  ;;  %s715_s26 = smov 128  }
   0xc   : > { %p496_p4 = pneg %p777_p3  ;;  %s716_s27 = smov 8  }
   0xd   : > { %s471_s28 = sadd.s32 4294967294, %s712_s17   ;;  %s39_s29 = sadd.s32 1, %s708_s16 }
   0xe   : > { %p497_p5 = pnand %p496_p4, %p769_p1  ;;  %s48_s30 = sadd.s32 1, %s700_s14 }
   0xf   : > { %p41_p7 = scmp.ge.s32.totalorder %s39_s29, 2  ;;  %p55_p8 = scmp.ne.s32.totalorder %s700_s14, %s696_s13 }
  0x10   : > { %499 = dma.hbm_to_vmem [thread:$0]  (!%p497_p5), %s170_s22, 256, %s172_s25, [#allocation7], %s715_s26, %s715_s26, %s716_s27  }
  0x11   : > { %p56_p9 = scmp.eq.s32.totalorder %s712_s17, 0  ;;  %p61_p10 = scmp.ne.s32.totalorder %s696_s13, %s692_s12 }
  0x12   : > { %s903_s29 = smov (%p41_p7, %s39_s29), 0  ;;  %p141_p13 = scmp.eq.s32.totalorder %s470_s18, 1 }
  0x13   : > { %p796_p11 = por %p56_p9, %p55_p8  ;;  %p802_p12 = por %p769_p1, %p61_p10 }
  0x14   : > { %s43_s6 = ssub.s32 %s708_s16, %s903_s29  ;;  %p147_p2 = scmp.eq.s32.totalorder %s471_s28, 1 }
  0x15   : > { %p46_p0 = scmp.eq.s32.totalorder %s43_s6, 0  ;;  %p808_p4 = por %p141_p13, %p55_p8 }
  0x16   : > { %p509_p5 = scmp.lt.s32.totalorder %s712_s17, 2  ;;  %p816_p7 = por %p147_p2, %p61_p10 }
  0x17   : > { %s814_s8 = scalar_select %p46_p0, %s700_s14, %s48_s30  }
  0x18   : > { %s191_s10 = sand.u32 1, %s700_s14   ;;  %s477_s20 = sshll.u32 %s708_s16, 3 }
  0x19   : > { %s476_s11 = sshll.u32 %s191_s10, 3  ;;  %s200_s18 = scalar_lea.hbm %s887_s0, %s477_s20 }
  0x1a   : > { %s195_s24 = scalar_lea.vmem [#allocation3], %s476_s11  ;;  %s202_s26 = sshll.u32 %s200_s18, 4  ;;  %s203_s26 = int_to_ptr.hbm [resolvable:$true] %s202_s26 }
  0x1b   : > { %s204_s25 = sshll.u32 %s195_s24, 4  ;;  %p501_p8 = pnand %p509_p5, %p796_p11  ;;  %s205_s25 = int_to_ptr.vmem [resolvable:$true] %s204_s25 }
  0x1c   : > { %s192_s27 = scalar_lea.sflag [#allocation4], %s191_s10  ;;  %213 = sbr.rel (%p777_p3) target bundleno = 222 (0xde), region = 32 }
  0x1d   : > { %503 = dma.hbm_to_vmem [thread:$0]  (!%p501_p8), %s203_s26, 128, %s205_s25, %s192_s27  }
  0x1e   : > { %s830_s28 = sand.u32 (!%p777_p3), 1, %s696_s13  }
  0x1f   : > { %s479_s30 = sshll.u32 (!%p777_p3), %s830_s28, 3  ;;  %s216_s6 = scalar_lea.sflag (!%p777_p3), [#allocation4], %s830_s28 }
  0x20   : > { %s219_s11 = scalar_lea.vmem (!%p777_p3), [#allocation3], %s479_s30 }
  0x21   : > { %679 = dma.done.wait (%p802_p12), %s216_s6, 128  }
  0x22   : > { %681 = vsyncadd (%p802_p12), %s216_s6, 4294967168 }
  0x23   : > { %683 = dma.done.wait (%p769_p1), [#allocation7], 256  }
  0x24   : > { %685 = vsyncadd (%p769_p1), [#allocation7], 4294967040  ;;  %v262_v0 = vld [vmem:[#allocation6 + $0x8] sm:$0xff]  ;;  %v261_v1 = vld [vmem:[#allocation6] sm:$0xff]  ;;  %vm264_vm0 = vcmask 130048   ;;  %s485_s19 = sshll.u32 %s704_s15, 3 }
  0x25   : > { %282 = vmatpush.msra.mxu0 %v262_v0  ;;  %v260_v2 = vld [vmem:[%s219_s11] sm:$0xff]  ;;  %s356_s20 = scalar_lea.hbm %s890_s3, %s485_s19  ;;  %s250_s21 = scalar_lea.vmem [#allocation8], %s479_s30 }
  0x26   : > { %v563_v3 = vld [vmem:[%s889_s2] ss:$0 sm:$0xff]  ;;  %s358_s22 = sshll.u32 %s250_s21, 4  ;;  %s360_s18 = sshll.u32 %s356_s20, 4  ;;  %s359_s22 = int_to_ptr.vmem [resolvable:$true] %s358_s22  ;;  %s361_s18 = int_to_ptr.hbm [resolvable:$true] %s360_s18 }
  0x27   : > { %283 = vmatpush.msra.mxu0 %v261_v1  ;;  %s345_s15 = scalar_lea.sflag [#allocation5], %s830_s28  ;;  %s640_s24 = sshra.s32 %s361_s18, 4  ;;  %s641_s24 = int_to_ptr.hbm [resolvable:$true] %s640_s24 }
  0x28   : > { %482 = vmatmul.msk.f32.vlgmr.msra.gmra.mxu0 %vm264_vm0, %v260_v2  ;;  %s642_s25 = scalar_lea.hbm %s641_s24, 8  ;;  %s646_s30 = scalar_lea.hbm %s890_s3, 16 }
  0x29   : > { %p643_p1 = scmp.ne.s32.totalorder %s641_s24, %s642_s25  ;;  %p647_p10 = scmp.lt.s32.totalorder %s641_s24, %s890_s3 }
  0x2a   : > { %p648_p11 = scmp.lt.s32.totalorder %s646_s30, %s642_s25 }
  0x2b   : > { %p644_p3 = pnand %p643_p1, %p808_p4 }
  0x2c   : > { %p649_p12 = por %p648_p11, %p647_p10 }
  0x2d   : > { %p645_p9 = pneg %p644_p3 }
  0x2f   : > { %p650_p13 = pnand %p649_p12, %p645_p9 }
  0xa5   : > { %v285_v4 = vpop.f32.mrf.mxu0 }
  0xa6   : > { %v298_v5 = vadd.f32 %v563_v3, %v285_v4 }
  0xa8   : > { %v300_v6 = vmul.f32 0.70710677, %v298_v5  ;;  %v299_v42 = vmul.f32 0.5, %v298_v5 }
  0xaa   : > { %v301_v7 = vmul.f32 %v300_v6, %v300_v6 }
  0xac   : > { %v302_v8 = vmin.f32 %v301_v7, 16.0 }
  0xae   : > { %v303_v9 = vmul.f32 2.1237322e-06, %v302_v8  ;;  %v314_v10 = vmul.f32 3.8918573e-05, %v302_v8 }
  0xb0   : > { %v304_v11 = vadd.f32 0.00028619796, %v303_v9  ;;  %v315_v12 = vadd.f32 0.001143296, %v314_v10 }
  0xb2   : > { %v305_v13 = vmul.f32 %v304_v11, %v302_v8  ;;  %v316_v14 = vmul.f32 %v315_v12, %v302_v8 }
  0xb4   : > { %v317_v15 = vadd.f32 0.014752088, %v316_v14  ;;  %v306_v16 = vadd.f32 0.0036580483, %v305_v13 }
  0xb6   : > { %v318_v17 = vmul.f32 %v317_v15, %v302_v8  ;;  %v307_v19 = vmul.f32 %v306_v16, %v302_v8 }
  0xb8   : > { %v319_v18 = vadd.f32 0.112945676, %v318_v17  ;;  %v308_v22 = vadd.f32 0.05243302, %v307_v19 }
  0xba   : > { %v320_v20 = vmul.f32 %v319_v18, %v302_v8  ;;  %v309_v25 = vmul.f32 %v308_v22, %v302_v8 }
  0xbc   : > { %v321_v21 = vadd.f32 0.4994258, %v320_v20  ;;  %v310_v26 = vadd.f32 0.18741608, %v309_v25 }
  0xbe   : > { %v322_v23 = vmul.f32 %v321_v21, %v302_v8  ;;  %v311_v28 = vmul.f32 %v310_v26, %v302_v8 }
  0xc0   : > { %v323_v24 = vadd.f32 1.0, %v322_v23  ;;  %v312_v32 = vadd.f32 1.1283791, %v311_v28 }
  0xc2   : > { %564 = vrcp.f32 %v323_v24  ;;  %v335_v31 = vand.u32 2147483648, %v323_v24  ;;  %v333_v34 = vand.u32 2147483647, %v323_v24  ;;  %vm329_vm2 = vweird.f32 %v323_v24 }
  0xc3   : > { %v313_v37 = vmul.f32 %v312_v32, %v300_v6 }
  0xc4   : > { %v336_v36 = vor.u32 1.1754944e-38, %v335_v31  ;;  %vm334_vm4 = vcmp.eq.f32.partialorder %v333_v34, 8.507059e+37 }
  0xc8   : > { %v565_v27 = vpop.eup %564 }
  0xc9   : > { %v325_v29 = vmul.f32 %v565_v27, %v323_v24  ;;  %vm330_vm1 = vweird.f32 %v565_v27 }
  0xca   : > { %vm331_vm3 = vmor %vm329_vm2, %vm330_vm1 }
  0xcb   : > { %v326_v30 = vsub.f32 1.0, %v325_v29 }
  0xcd   : > { %v327_v33 = vmul.f32 %v565_v27, %v326_v30 }
  0xcf   : > { %v328_v35 = vadd.f32 %v565_v27, %v327_v33 }
  0xd1   : > { %v332_v38 = vsel %vm331_vm3, %v565_v27, %v328_v35 }
  0xd2   : > { %v337_v39 = vsel %vm334_vm4, %v336_v36, %v332_v38 }
  0xd3   : > { %v338_v40 = vmul.f32 %v337_v39, %v313_v37 }
  0xd5   : > { %v483_v41 = vclamps-f32 %v338_v40, 1.0 }
  0xd7   : > { %v341_v43 = vadd.f32 1.0, %v483_v41 }
  0xd9   : > { %v342_v44 = vmul.f32 %v341_v43, %v299_v42 }
  0xdb   : > { %343 = vst [vmem:[%s250_s21] sm:$0xff] %v342_v44 }
  0xdc   : > { %653 = shalt.err (!%p650_p13)
}
  0xdd   : > { %494 = dma.vmem_to_hbm [thread:$0]  (%p808_p4), %s359_s22, 128, %s361_s18, %s345_s15  }
  0xde PF: > { %s372_s28 = sand.u32 1, %s692_s12   ;;  %p505_p0 = pnand %p475_p6, %p816_p7 }
  0xdf   : > { %s373_s23 = scalar_lea.sflag [#allocation5], %s372_s28 }
  0xe0   : > { %p506_p2 = pneg %p505_p0 }
  0xe2   : > { %687 = dma.done.wait (%p506_p2), %s373_s23, 128  }
  0xe3   : > { %689 = vsyncadd (%p506_p2), %s373_s23, 4294967168  ;;  %s20_s17 = sadd.s32 1, %s712_s17   ;;  %s897_s12 = smov %s696_s13 }
  0xe4   : > { %p17_p5 = scmp.ge.s32.totalorder %s20_s17, 4   ;;  %s898_s13 = smov %s700_s14 }
  0xe5   : > { %s899_s14 = smov %s814_s8  ;;  %s900_s15 = smov %s708_s16 }
  0xe6   : > { %s901_s16 = smov %s903_s29  ;;  %19 = sbr.rel (!%p17_p5) target bundleno = 7 (0x7), region = 93 }
  0xeb   :  { %379 = vsyncpa [#allocation4], 1 }
  0xec   :  { %381 = vsyncpa [#allocation4 + $0x1], 1 }
  0xed   :  { %382 = vsyncpa [#allocation7], 1 }
  0xee   :  { %383 = vsyncpa [#allocation5], 1 }
  0xef   :  { %385 = vsyncpa [#allocation5 + $0x1], 1 }

</bundles_post_ra>
